<compile_context>
chip_gen: v6e
topology: v6e:2x2x1
jax: 0.10.0
libtpu: 0.0.40
codegen_flags: <defaults>
</compile_context>

<pallas_src>
import jax
import jax.numpy as jnp
from jax.experimental import pallas as pl
from jax.experimental.pallas import tpu as pltpu

LANE = 128


# ---------------------------------------------------------------------------
# Kernels
# ---------------------------------------------------------------------------
def _relu_linear_single_k(x_ref, w_ref, b_ref, o_ref):
    """Whole contraction in one K step: dot -> +bias -> ReLU -> store."""
    y = jnp.dot(x_ref[...], w_ref[...], preferred_element_type=jnp.float32)
    o_ref[...] = jnp.maximum(y + b_ref[...], 0.0).astype(o_ref.dtype)


def _relu_linear_acc_out(x_ref, w_ref, b_ref, o_ref):
    """Multi K step, f32 output: accumulate directly into the resident o_ref
    block (its block index is constant along k) -> no VMEM scratch needed."""
    k = pl.program_id(2)

    @pl.when(k == 0)
    def _init():
        o_ref[...] = jnp.zeros_like(o_ref)

    o_ref[...] += jnp.dot(x_ref[...], w_ref[...],
                          preferred_element_type=jnp.float32)

    @pl.when(k == pl.num_programs(2) - 1)
    def _finalize():
        o_ref[...] = jnp.maximum(o_ref[...] + b_ref[...], 0.0)


def _relu_linear_acc_scratch(x_ref, w_ref, b_ref, o_ref, acc_ref):
    """Multi K step, non-f32 output: f32 VMEM accumulator scratch."""
    k = pl.program_id(2)

    @pl.when(k == 0)
    def _init():
        acc_ref[...] = jnp.zeros_like(acc_ref)

    acc_ref[...] += jnp.dot(x_ref[...], w_ref[...],
                            preferred_element_type=jnp.float32)

    @pl.when(k == pl.num_programs(2) - 1)
    def _finalize():
        o_ref[...] = jnp.maximum(acc_ref[...] + b_ref[...], 0.0).astype(o_ref.dtype)


# ---------------------------------------------------------------------------
# Helpers
# ---------------------------------------------------------------------------
def _round_up(n, m):
    return ((n + m - 1) // m) * m


def _sublane(dtype):
    # f32 -> 8, bf16 -> 16, int8/fp8 -> 32 rows per packed vreg sublane group.
    return max(8, 32 // jnp.dtype(dtype).itemsize)


def _pad_cast(arr, shape, dtype):
    """Zero-pad + cast, but a no-op (no extra HBM pass) when already aligned."""
    dtype = jnp.dtype(dtype)
    if tuple(arr.shape) == tuple(shape) and arr.dtype == dtype:
        return arr
    out = jnp.zeros(shape, dtype)
    return out.at[tuple(slice(0, s) for s in arr.shape)].set(arr.astype(dtype))


def _pick_tile(padded, unit, cap):
    """Largest multiple of `unit` that divides `padded` and is <= cap."""
    best = unit
    t = unit
    hi = min(padded, cap)
    while t <= hi:
        if padded % t == 0:
            best = t
        t += unit
    return best


def _vmem_budget():
    """Generation-aware tile caps + scoped-VMEM limit."""
    try:
        cap = int(pltpu.get_tpu_info().vmem_capacity_bytes)
    except Exception:
        cap = 64 << 20  # conservative (v7x-class) fallback
    if cap >= (96 << 20):                      # v5e / v6e: 128 MiB physical VMEM
        caps = {"tm": 512, "tn": 1024, "tk": 1024}
    else:                                      # v7x-class: 64 MiB per TC
        caps = {"tm": 256, "tn": 1024, "tk": 1024}
    vmem_limit = min((cap * 3) // 4, 100 << 20)
    return caps, vmem_limit


# ---------------------------------------------------------------------------
# Parameter preparation (do this ONCE per set of weights)
# ---------------------------------------------------------------------------
def prepare_relu_block_params(w_io, b, compute_dtype=jnp.float32):
    """Pad/cast the static Linear parameters once, outside the per-call path.

    w_io : (D_in, D_out)  weight in (in, out) layout (== PyTorch weight.T)
    b    : (D_out,)
    Returns (wp, bp, D_in, D_out): wp is (Kp, Np) in compute_dtype, bp is
    (1, Np) f32, with Kp/Np padded only to the 128-lane tile.
    """
    D_in, D_out = w_io.shape
    Kp = _round_up(D_in, LANE)
    Np = _round_up(D_out, LANE)
    wp = _pad_cast(w_io, (Kp, Np), compute_dtype)
    bp = _pad_cast(jnp.reshape(b, (1, D_out)), (1, Np), jnp.float32)
    return wp, bp, D_in, D_out


# ---------------------------------------------------------------------------
# Forward pass
# ---------------------------------------------------------------------------
def relu_block_prepared(x, wp, bp, d_in, d_out, *, tm=None, tn=None, tk=None):
    """y = relu(x @ W + b) with pre-padded/cast parameters (wp, bp)."""
    B, x_din = x.shape
    assert x_din == d_in
    cdt = jnp.dtype(wp.dtype)                 # matmul operand dtype
    out_dtype = jnp.dtype(x.dtype)            # output stays in x's dtype
    Kp, Np = wp.shape
    sub = _sublane(cdt)
    caps, vmem_limit = _vmem_budget()

    # --- tile selection: pad only to the dtype tile, tiles divide padded dims
    if tm is None:
        Mp = _round_up(B, sub)
        tm = _pick_tile(Mp, sub, caps["tm"])
    else:
        tm = _round_up(tm, sub)
        Mp = _round_up(B, tm)

    tn_auto = tn is None
    if tn_auto:
        tn = _pick_tile(Np, LANE, caps["tn"])
    else:
        assert Np % tn == 0, "forced tn must divide padded D_out"

    # v7x has 2 TensorCores: ensure >= 2 parallel (i, j) tiles when N allows,
    # so one core isn't idle (harmless on single-TC v5e/v6e).
    if tn_auto and (Mp // tm) * (Np // tn) < 2 and Np >= 2 * LANE:
        tn = _pick_tile(Np, LANE, max(LANE, Np // 2))

    if tk is None:
        tk = _pick_tile(Kp, LANE, caps["tk"])
    else:
        assert Kp % tk == 0, "forced tk must divide padded D_in"

    grid = (Mp // tm, Np // tn, Kp // tk)
    gm, gn, gk = grid

    # --- activations: pad/cast only if needed (no-op when aligned)
    xp = _pad_cast(x, (Mp, Kp), cdt)

    # --- kernel variant: scratch-free whenever possible
    if gk == 1:
        kernel = _relu_linear_single_k
        scratch = []
    elif out_dtype == jnp.float32:
        kernel = _relu_linear_acc_out
        scratch = []
    else:
        kernel = _relu_linear_acc_scratch
        scratch = [pltpu.VMEM((tm, tn), jnp.float32)]

    in_itemsize = cdt.itemsize
    out_itemsize = out_dtype.itemsize
    cost = pl.CostEstimate(
        flops=2 * Mp * Np * Kp,
        transcendentals=0,
        bytes_accessed=(gn * Mp * Kp * in_itemsize       # x re-read per N tile
                        + gm * Kp * Np * in_itemsize     # W re-read per M tile
                        + gm * gn * gk * tn * 4          # bias per grid step
                        + Mp * Np * out_itemsize),       # output write
    )

    out_padded = pl.pallas_call(
        kernel,
        out_shape=jax.ShapeDtypeStruct((Mp, Np), out_dtype),
        grid=grid,
        in_specs=[
            pl.BlockSpec((tm, tk), lambda i, j, k: (i, k)),   # x tile
            pl.BlockSpec((tk, tn), lambda i, j, k: (k, j)),   # W tile
            pl.BlockSpec((1, tn), lambda i, j, k: (0, j)),    # bias tile
        ],
        out_specs=pl.BlockSpec((tm, tn), lambda i, j, k: (i, j)),
        scratch_shapes=scratch,
        compiler_params=pltpu.CompilerParams(
            dimension_semantics=("parallel", "parallel", "arbitrary"),
            vmem_limit_bytes=vmem_limit),
        cost_estimate=cost,
    )(xp, wp, bp)

    return out_padded[:B, :d_out]


def relu_block(x, w_io, b, *, compute_dtype=None, tm=None, tn=None, tk=None):
    """Convenience wrapper: y = relu(x @ w_io + b).

    x:    (B, D_in) float32
    w_io: (D_in, D_out) weight in (in, out) layout (== PyTorch weight.T)
    b:    (D_out,)
    compute_dtype: optional matmul operand dtype (e.g. jnp.bfloat16);
                   accumulation and the bias/ReLU epilogue stay f32.
    For repeated calls with the same weights, call prepare_relu_block_params
    once and use relu_block_prepared directly.
    """
    cdt = compute_dtype if compute_dtype is not None else x.dtype
    wp, bp, d_in, d_out = prepare_relu_block_params(w_io, b, cdt)
    return relu_block_prepared(x, wp, bp, d_in, d_out, tm=tm, tn=tn, tk=tk)


# ---------------------------------------------------------------------------
# Self-test
# ---------------------------------------------------------------------------
if __name__ == "__main__":
    hi = jax.lax.Precision.HIGHEST
    key = jax.random.PRNGKey(0)
    k1, k2, k3 = jax.random.split(key, 3)

    # ----- Test 1: exactly the PyTorch module (dim=10, batch=8), f32 path. --
    dim, batch = 10, 8
    w_torch = 2.3 * jnp.ones((dim, dim), dtype=jnp.float32)   # PyTorch (out, in)
    w_io = w_torch.T                                          # (in, out)
    b = -1.22 * jnp.ones((dim,), dtype=jnp.float32)
    x = jax.random.normal(k1, (batch, dim), dtype=jnp.float32)

    wp, bp, d_in, d_out = prepare_relu_block_params(w_io, b)  # pad/cast once
    out = relu_block_prepared(x, wp, bp, d_in, d_out)
    jax.block_until_ready(out)

    ref = jnp.maximum(jnp.dot(x, w_io, precision=hi) + b, 0.0)
    assert out.shape == ref.shape
    assert jnp.allclose(out, ref, atol=1e-5, rtol=1e-5), "f32 mismatch vs reference"

    # ----- Test 2: dim=256, forced small tiles -> multi-K resident-output ---
    # ----- accumulation path (grid (1, 2, 2)); tight tolerance. --------------
    dim2, batch2 = 256, 64
    w2_io = (2.3 * jnp.ones((dim2, dim2), dtype=jnp.float32)).T
    b2 = -1.22 * jnp.ones((dim2,), dtype=jnp.float32)
    x2 = jax.random.normal(k2, (batch2, dim2), dtype=jnp.float32)

    out2 = relu_block(x2, w2_io, b2, tm=64, tn=128, tk=128)
    jax.block_until_ready(out2)
    ref2 = jnp.maximum(jnp.dot(x2, w2_io, precision=hi) + b2, 0.0)
    assert jnp.allclose(out2, ref2, atol=1e-4, rtol=1e-4), "tiled-path mismatch"

    # ----- Test 3: auto tile selection on aligned dims (no wrapper padding) --
    # ----- and the >=2-parallel-tile split for v7x. ---------------------------
    dim3, batch3 = 512, 128
    w3_io = (2.3 * jnp.ones((dim3, dim3), dtype=jnp.float32)).T
    b3 = -1.22 * jnp.ones((dim3,), dtype=jnp.float32)
    x3 = jax.random.normal(k3, (batch3, dim3), dtype=jnp.float32)

    out3 = relu_block(x3, w3_io, b3)
    jax.block_until_ready(out3)
    ref3 = jnp.maximum(jnp.dot(x3, w3_io, precision=hi) + b3, 0.0)
    assert jnp.allclose(out3, ref3, atol=1e-4, rtol=1e-4), "auto-tile mismatch"

    # ----- Test 4: bf16 weight/compute fast path (perf option), loose tol. --
    out_bf16 = relu_block(x, w_io, b, compute_dtype=jnp.bfloat16)
    jax.block_until_ready(out_bf16)
    assert jnp.allclose(out_bf16, ref, atol=0.25, rtol=0.05), "bf16 path mismatch"

    print("KERNEL_OK")
</pallas_src>

<mosaic_0001>
module attributes {stable_mosaic.version = 11 : i64} {
  func.func @_relu_linear_single_k(%arg0: i32, %arg1: i32, %arg2: i32, %arg3: memref<8x128xf32, #tpu.memory_space<vmem>>, %arg4: memref<128x128xf32, #tpu.memory_space<vmem>>, %arg5: memref<1x128xf32, #tpu.memory_space<vmem>>, %arg6: memref<8x128xf32, #tpu.memory_space<vmem>>) attributes {dimension_semantics = [#tpu.dimension_semantics<parallel>, #tpu.dimension_semantics<parallel>, #tpu.dimension_semantics<arbitrary>], iteration_bounds = array<i64: 1, 1, 1>, scalar_prefetch = 0 : i64, scratch_operands = 0 : i64, tpu.core_type = #tpu.core_type<tc>, window_params = [{transform_indices = @transform_0, window_bounds = array<i64: 8, 128>}, {transform_indices = @transform_1, window_bounds = array<i64: 128, 128>}, {transform_indices = @transform_2, window_bounds = array<i64: 1, 128>}, {transform_indices = @transform_3, window_bounds = array<i64: 8, 128>}]} {
    %c0 = arith.constant 0 : index
    %c0_0 = arith.constant 0 : index
    %0 = vector.load %arg3[%c0, %c0_0] : memref<8x128xf32, #tpu.memory_space<vmem>>, vector<8x128xf32>
    %c0_1 = arith.constant 0 : index
    %c0_2 = arith.constant 0 : index
    %1 = vector.load %arg4[%c0_1, %c0_2] : memref<128x128xf32, #tpu.memory_space<vmem>>, vector<128x128xf32>
    %cst = arith.constant dense<0.000000e+00> : vector<8x128xf32>
    %2 = tpu.matmul %0, %1, %cst {dimension_numbers = #tpu.dot_dimension_numbers<[1], [0], [0], [1], [0, 0, 1, 1], [], []>} : vector<8x128xf32>, vector<128x128xf32>, vector<8x128xf32> -> vector<8x128xf32>
    %c0_3 = arith.constant 0 : index
    %c0_4 = arith.constant 0 : index
    %3 = vector.load %arg5[%c0_3, %c0_4] : memref<1x128xf32, #tpu.memory_space<vmem>>, vector<1x128xf32>
    %4 = vector.broadcast %3 : vector<1x128xf32> to vector<8x128xf32>
    %5 = arith.addf %2, %4 : vector<8x128xf32>
    %cst_5 = arith.constant 0.000000e+00 : f32
    %6 = vector.broadcast %cst_5 : f32 to vector<8x128xf32>
    %7 = arith.maximumf %5, %6 : vector<8x128xf32>
    %c0_6 = arith.constant 0 : index
    %c0_7 = arith.constant 0 : index
    %8 = vector.load %arg6[%c0_6, %c0_7] : memref<8x128xf32, #tpu.memory_space<vmem>>, vector<8x128xf32>
    tpu.vector_store %arg6[%c0_6, %c0_7], %7 {strides = array<i32>} : memref<8x128xf32, #tpu.memory_space<vmem>>, vector<8x128xf32>,
    return
  }
  func.func @transform_0(%arg0: i32, %arg1: i32, %arg2: i32) -> (i32, i32) {
    %c0_i32 = arith.constant 0 : i32
    return %arg0, %arg2 : i32, i32
  }
  func.func @transform_1(%arg0: i32, %arg1: i32, %arg2: i32) -> (i32, i32) {
    %c0_i32 = arith.constant 0 : i32
    return %arg2, %arg1 : i32, i32
  }
  func.func @transform_2(%arg0: i32, %arg1: i32, %arg2: i32) -> (i32, i32) {
    %c0_i32 = arith.constant 0 : i32
    %c0_i32_0 = arith.constant 0 : i32
    return %c0_i32, %arg1 : i32, i32
  }
  func.func @transform_3(%arg0: i32, %arg1: i32, %arg2: i32) -> (i32, i32) {
    %c0_i32 = arith.constant 0 : i32
    return %arg0, %arg1 : i32, i32
  }
}

</mosaic_0001>

<bundles_post_ra>
// kernel: tpu_custom_call.1
= control target key start
LH: loop header
LB: loop body
LE: loop exit
PB: predicated region body
PF: predicated region fallthrough
CT: control target
= control target key end

     0   :  { %8 = vsyncpa [#allocation3], 0  ;;  %s318_s0 = inlined_call_operand.hbm [shape: f32[8,128], index: 0, kind: input, shape index: {}]   ;;  %s319_s1 = inlined_call_operand.hbm [shape: f32[128,128], index: 1, kind: input, shape index: {}]   ;;  %s320_s2 = inlined_call_operand.vmem [shape: f32[1,128], index: 2, kind: input, shape index: {}]   ;;  %s321_s3 = inlined_call_operand.hbm [shape: f32[8,128], index: 3, kind: output, shape index: {}]  }
   0x1   :  { %9 = vsyncpa [#allocation6], 0 }
   0x2   :  { %10 = vsyncpa [#allocation4], 0  ;;  %s279_s12 = smov [#allocation2]   ;;  %s280_s14 = smov [#allocation5]  }
   0x3   :  { %s17_s13 = sshll.u32 %s279_s12, 4  ;;  %s26_s15 = sshll.u32 %s280_s14, 4  ;;  %s18_s13 = int_to_ptr.vmem [resolvable:$true] %s17_s13  ;;  %s27_s15 = int_to_ptr.vmem [resolvable:$true] %s26_s15 }
   0x4   :  { %s221_s16 = scalar_lea.vmem %s18_s13, 128  ;;  %p226_p1 = scmp.lt.s32.totalorder %s18_s13, %s18_s13 }
   0x5   :  { %p222_p0 = scmp.ne.s32.totalorder %s18_s13, %s221_s16  ;;  %p227_p2 = scmp.lt.s32.totalorder %s221_s16, %s221_s16 }
   0x7   :  { %p228_p3 = por %p227_p2, %p226_p1 }
   0x9   :  { %p229_p4 = pnand %p228_p3, %p222_p0 }
   0xb   :  { %232 = shalt.err (!%p229_p4)
}
   0xc   :  { %20 = dma.hbm_to_vmem [thread:$0]  %s318_s0, 128, %s18_s13, [#allocation3]  }
   0xd   :  { %s241_s19 = scalar_lea.vmem %s27_s15, 2048  ;;  %p246_p6 = scmp.lt.s32.totalorder %s27_s15, %s27_s15 }
   0xe   :  { %p242_p5 = scmp.ne.s32.totalorder %s27_s15, %s241_s19  ;;  %p247_p7 = scmp.lt.s32.totalorder %s241_s19, %s241_s19 }
  0x10   :  { %p248_p8 = por %p247_p7, %p246_p6 }
  0x12   :  { %p249_p9 = pnand %p248_p8, %p242_p5 }
  0x14   :  { %252 = shalt.err (!%p249_p9)
}
  0x15   :  { %s281_s20 = smov 128   ;;  %s282_s21 = smov 8  }
  0x16   :  { %32 = dma.hbm_to_vmem [thread:$0]  %s319_s1, 2048, %s27_s15, [#allocation6], %s281_s20, %s281_s20, %s282_s21  }
  0x17   :  { %273 = dma.done.wait [#allocation3], 128  }
  0x18   :  { %274 = vsyncadd [#allocation3], 4294967168 }
  0x19   :  { %275 = dma.done.wait [#allocation6], 2048  }
  0x1a   :  { %276 = vsyncadd [#allocation6], 4294965248  ;;  %v283_v0 = vmov 0.0   ;;  %vm284_vm0 = vmmov 0   ;;  %v57_v1 = vld [vmem:[#allocation5 + $0x78] sm:$0xff]  ;;  %v56_v2 = vld [vmem:[#allocation5 + $0x70] sm:$0xff] }
  0x1b   :  { %171 = vmatprep.subr.mxu0 %v283_v0  ;;  %203 = vmatprep.mubr.msk.f32.mxu0 %vm284_vm0, %v283_v0  ;;  %v55_v3 = vld [vmem:[#allocation5 + $0x68] sm:$0xff]  ;;  %v54_v4 = vld [vmem:[#allocation5 + $0x60] sm:$0xff]  ;;  %v53_v5 = vld [vmem:[#allocation5 + $0x58] sm:$0xff]  ;;  %s285_s24 = smov [#allocation7]  }
  0x1c   :  { %172 = vmatpush3.msra.mxu0 %v57_v1  ;;  %v52_v6 = vld [vmem:[#allocation5 + $0x50] sm:$0xff]  ;;  %v51_v7 = vld [vmem:[#allocation5 + $0x48] sm:$0xff]  ;;  %v50_v8 = vld [vmem:[#allocation5 + $0x40] sm:$0xff]  ;;  %s143_s25 = sshll.u32 %s285_s24, 4  ;;  %s144_s25 = int_to_ptr.vmem [resolvable:$true] %s143_s25 }
  0x1d   :  { %173 = vmatprep.subr.mxu0 %v283_v0  ;;  %v49_v9 = vld [vmem:[#allocation5 + $0x38] sm:$0xff]  ;;  %v48_v10 = vld [vmem:[#allocation5 + $0x30] sm:$0xff]  ;;  %v47_v11 = vld [vmem:[#allocation5 + $0x28] sm:$0xff]  ;;  %s253_s26 = scalar_lea.vmem %s144_s25, 128  ;;  %p258_p11 = scmp.lt.s32.totalorder %s144_s25, %s144_s25 }
  0x1e   :  { %174 = vmatpush3.msra.mxu0 %v56_v2  ;;  %v46_v12 = vld [vmem:[#allocation5 + $0x20] sm:$0xff]  ;;  %v45_v13 = vld [vmem:[#allocation5 + $0x18] sm:$0xff]  ;;  %v44_v14 = vld [vmem:[#allocation5 + $0x10] sm:$0xff]  ;;  %p254_p10 = scmp.ne.s32.totalorder %s144_s25, %s253_s26  ;;  %p259_p12 = scmp.lt.s32.totalorder %s253_s26, %s253_s26 }
  0x1f   :  { %175 = vmatprep.subr.mxu0 %v283_v0  ;;  %v43_v15 = vld [vmem:[#allocation5 + $0x8] sm:$0xff]  ;;  %v42_v16 = vld [vmem:[#allocation5] sm:$0xff]  ;;  %v41_v17 = vld [vmem:[#allocation2] sm:$0xff] }
  0x20   :  { %176 = vmatpush3.msra.mxu0 %v55_v3  ;;  %v153_v18 = vld [vmem:[%s320_s2] ss:$0 sm:$0xff]  ;;  %p260_p13 = por %p259_p12, %p258_p11 }
  0x21   :  { %177 = vmatprep.subr.mxu0 %v283_v0 }
  0x22   :  { %178 = vmatpush3.msra.mxu0 %v54_v4  ;;  %p261_p0 = pnand %p260_p13, %p254_p10 }
  0x23   :  { %179 = vmatprep.subr.mxu0 %v283_v0 }
  0x24   :  { %180 = vmatpush3.msra.mxu0 %v53_v5 }
  0x25   :  { %181 = vmatprep.subr.mxu0 %v283_v0 }
  0x26   :  { %182 = vmatpush3.msra.mxu0 %v52_v6 }
  0x27   :  { %183 = vmatprep.subr.mxu0 %v283_v0 }
  0x28   :  { %184 = vmatpush3.msra.mxu0 %v51_v7 }
  0x29   :  { %185 = vmatprep.subr.mxu0 %v283_v0 }
  0x2a   :  { %186 = vmatpush3.msra.mxu0 %v50_v8 }
  0x2b   :  { %187 = vmatprep.subr.mxu0 %v283_v0 }
  0x2c   :  { %188 = vmatpush3.msra.mxu0 %v49_v9 }
  0x2d   :  { %189 = vmatprep.subr.mxu0 %v283_v0 }
  0x2e   :  { %190 = vmatpush3.msra.mxu0 %v48_v10 }
  0x2f   :  { %191 = vmatprep.subr.mxu0 %v283_v0 }
  0x30   :  { %192 = vmatpush3.msra.mxu0 %v47_v11 }
  0x31   :  { %193 = vmatprep.subr.mxu0 %v283_v0 }
  0x32   :  { %194 = vmatpush3.msra.mxu0 %v46_v12 }
  0x33   :  { %195 = vmatprep.subr.mxu0 %v283_v0 }
  0x34   :  { %196 = vmatpush3.msra.mxu0 %v45_v13 }
  0x35   :  { %197 = vmatprep.subr.mxu0 %v283_v0 }
  0x36   :  { %198 = vmatpush3.msra.mxu0 %v44_v14 }
  0x37   :  { %199 = vmatprep.subr.mxu0 %v283_v0 }
  0x38   :  { %200 = vmatpush3.msra.mxu0 %v43_v15 }
  0x39   :  { %201 = vmatprep.subr.mxu0 %v283_v0 }
  0x3a   :  { %202 = vmatpush3.msra.mxu0 %v42_v16 }
  0x3b   :  { %204 = vmatmul.mubr.f32.vlgmr.msra.gmra.mxu0 %v41_v17 }
  0xfb   :  { %v131_v19 = vpop.f32.mrf.mxu0 }
  0xfc   :  { %v132_v20 = vadd.f32 %v153_v18, %v131_v19 }
  0xfd   :  { %v205_v21 = vpop.f32.mrf.mxu0 }
  0xfe   :  { %v135_v22 = vmax.f32 %v132_v20, 0.0 }
 0x100   :  { %136 = vst [vmem:[#allocation7] sm:$0xff] %v135_v22 }
 0x101   :  { %264 = shalt.err (!%p261_p0)
}
 0x102   :  { %146 = dma.vmem_to_hbm [thread:$0]  %s144_s25, 128, %s321_s3, [#allocation4]  }
 0x103   :  { %277 = dma.done.wait [#allocation4], 128  }
 0x104   :  { %278 = vsyncadd [#allocation4], 4294967168 }
 0x105   :  { %150 = vsyncpa [#allocation3], 1 }
 0x106   :  { %151 = vsyncpa [#allocation6], 1 }
 0x107   :  { %152 = vsyncpa [#allocation4], 1 }

</bundles_post_ra>
